<compile_context>
chip_gen: v6e
topology: v6e:2x2x1
jax: 0.10.0
libtpu: 0.0.40
codegen_flags: <defaults>
</compile_context>

<pallas_src>
import functools
import math

import jax
import jax.numpy as jnp
from jax import lax
from jax.experimental import pallas as pl
from jax.experimental.pallas import tpu as pltpu


# ---------------------------------------------------------------------------
# Kernel A: batched input projection  wx = x2d @ W  + BN partial sums
# ---------------------------------------------------------------------------
def ligru_proj_kernel(x_ref, w_ref, wx_ref, stats_ref):
    """
    x_ref    : (tm, F)     bf16  time-major row tile of the input
    w_ref    : (F, 2H)     bf16  fused gate weights (W^T), grid-resident
    wx_ref   : (tm, 2H)    bf16  projected rows (bf16 halves HBM round trip)
    stats_ref: (1, 8, 2H)  f32   row 0 = per-tile sum, row 1 = per-tile sumsq
                                 (rows 2..7 zero padding for sublane tiling)
    """
    acc = jnp.dot(x_ref[...], w_ref[...], preferred_element_type=jnp.float32)
    wx_ref[...] = acc.astype(jnp.bfloat16)
    g = acc.shape[1]
    s1 = jnp.sum(acc, axis=0, keepdims=True)            # (1, 2H)
    s2 = jnp.sum(acc * acc, axis=0, keepdims=True)       # (1, 2H)
    stats_ref[...] = jnp.concatenate(
        [s1, s2, jnp.zeros((6, g), jnp.float32)], axis=0)[None]


# ---------------------------------------------------------------------------
# Kernel B: time-chunk-streamed LiGRU recurrence (BN affine folded per step)
# ---------------------------------------------------------------------------
def ligru_rec_kernel(wx_ref, u_ref, scale_ref, shift_ref,
                     out_ref, hlast_ref, h_scr, ot_scr, *, tc, H, unroll):
    """
    wx_ref   : (tc, bb, 2H) bf16  projected input, time-major chunk (streamed)
    u_ref    : (H, 2H)      bf16  fused recurrent weights (U^T)
    scale_ref: (1, 2H)      f32   folded BN scale  gamma / sqrt(var + eps)
    shift_ref: (1, 2H)      f32   folded BN shift  beta - mean * scale
    out_ref  : (bb, tc, H)  f32   hidden states, batch-major (final layout)
    hlast_ref: (bb, H)      f32   final hidden state for this batch block
    h_scr    : (bb, H)      f32   hidden-state carry across time chunks
    ot_scr   : (tc, bb, H)  f32   time-major staging, copied out once/chunk
    """
    @pl.when(pl.program_id(1) == 0)
    def _():
        h_scr[...] = jnp.zeros_like(h_scr)

    scale = scale_ref[...]                                # (1, 2H)
    shift = shift_ref[...]                                # (1, 2H)
    u_bf = u_ref[...]                                     # (H, 2H) bf16

    def rec_step(k, ht):
        # BN affine applied in-step (VPU filler hidden under the dot).
        wn = wx_ref[k].astype(jnp.float32) * scale + shift           # (bb,2H)
        gates = wn + jnp.dot(ht.astype(jnp.bfloat16), u_bf,
                             preferred_element_type=jnp.float32)
        zt = jax.nn.sigmoid(gates[:, H:])
        hcand = jnp.maximum(gates[:, :H], 0.0)   # relu; dropout p=0 -> mask=1
        ht = hcand + zt * (ht - hcand)           # == zt*ht + (1 - zt)*hcand
        ot_scr[k] = ht
        return ht

    h_final = lax.fori_loop(0, tc, rec_step, h_scr[...], unroll=unroll)
    h_scr[...] = h_final
    hlast_ref[...] = h_final

    # Flush the chunk into the batch-major output block in-kernel (avoids a
    # full T*B*H HBM read+write transpose pass after the pallas_call).
    ot = ot_scr[...]                                       # (tc, bb, H)
    for b in range(ot.shape[1]):                           # static bb copies
        out_ref[b] = ot[:, b, :]


# ---------------------------------------------------------------------------
# Helpers
# ---------------------------------------------------------------------------
def _vmem_capacity_bytes():
    try:
        return int(pltpu.get_tpu_info().vmem_capacity_bytes)
    except Exception:
        return 64 * 1024 * 1024            # conservative: v7x per-TC VMEM


def _vmem_limit(need_bytes, cap_bytes):
    # Clamp the scoped-VMEM request below physical capacity (v7x: 64 MiB).
    lim = max(int(need_bytes) + (8 << 20), 32 << 20)
    lim = min(lim, cap_bytes - (8 << 20))
    return int(max(lim, 16 << 20))


def _pick_time_chunk(T, per_step_bytes, budget_bytes=8 << 20, max_chunk=128):
    # Legal chunk sizes divide T and are a multiple of 8 (sublane tile) or T.
    legal = [d for d in range(1, T + 1)
             if T % d == 0 and (d % 8 == 0 or d == T)]
    fits = [d for d in legal
            if d <= max_chunk and d * per_step_bytes <= budget_bytes]
    return max(fits) if fits else min(legal)


# ---------------------------------------------------------------------------
# Wrapper
# ---------------------------------------------------------------------------
def ligru_forward(x, params):
    """LiGRU forward (num_layers=1, unidirectional).

    x : (B, T, F) float32  ->  (output (B, T, H), hh (1, B, H))
    params: w (F, 2H), u (H, 2H), gamma (1, 2H), beta (1, 2H)
    """
    B, T, F = x.shape
    H = params["u"].shape[0]
    G = 2 * H
    eps = 1e-5
    n = T * B
    cap = _vmem_capacity_bytes()

    # ---- Kernel A: projection over all T*B rows (time-major row order) ----
    x2d = jnp.transpose(x, (1, 0, 2)).reshape(n, F)
    tm = None
    for cand in (512, 256, 128, 64, 32, 16):   # prefer big tiles that divide
        if n % cand == 0:
            tm = cand
            break
    if tm is None:
        tm = 512 if n > 512 else ((n + 15) // 16) * 16   # bf16: 16-row tiles
    m_pad = ((n + tm - 1) // tm) * tm
    if m_pad != n:
        # zero rows project to zero wx rows -> contribute 0 to the BN partials
        x2d = jnp.pad(x2d, ((0, m_pad - n), (0, 0)))
    n_tiles = m_pad // tm

    x_bf = x2d.astype(jnp.bfloat16)
    w_bf = params["w"].astype(jnp.bfloat16)               # (F, 2H)
    u_bf = params["u"].astype(jnp.bfloat16)               # (H, 2H)

    need_a = 2 * (tm * F * 2 + tm * G * 2 + 8 * G * 4) + 2 * F * G * 2
    wx_bf, stats = pl.pallas_call(
        ligru_proj_kernel,
        out_shape=(jax.ShapeDtypeStruct((m_pad, G), jnp.bfloat16),
                   jax.ShapeDtypeStruct((n_tiles, 8, G), jnp.float32)),
        grid=(n_tiles,),
        in_specs=[pl.BlockSpec((tm, F), lambda i: (i, 0)),
                  pl.BlockSpec((F, G), lambda i: (0, 0))],
        out_specs=(pl.BlockSpec((tm, G), lambda i: (i, 0)),
                   pl.BlockSpec((1, 8, G), lambda i: (i, 0, 0))),
        compiler_params=pltpu.CompilerParams(
            dimension_semantics=("parallel",),
            vmem_limit_bytes=_vmem_limit(need_a, cap)),
    )(x_bf, w_bf)

    wx = wx_bf[:n].reshape(T, B, G)      # bf16; free reshape when tm | T*B

    # ---- BN stats from per-tile partials (tiny XLA ops), folded affine ----
    sum_g = jnp.sum(stats[:, 0, :], axis=0)                # (2H,)
    sq_g = jnp.sum(stats[:, 1, :], axis=0)                 # (2H,)
    mean = sum_g / n
    var = jnp.maximum(sq_g / n - mean * mean, 0.0)         # biased (BN train)
    scale = (params["gamma"].reshape(G) * lax.rsqrt(var + eps)).reshape(1, G)
    shift = (params["beta"].reshape(G) - mean * scale.reshape(G)).reshape(1, G)

    # ---- Kernel B: streamed serial recurrence ------------------------------
    # Batch split across TensorCores only when each half spans >= 2 sublane
    # tiles (no-op on v5e/v6e single-core chips).
    n_bc = 2 if (B >= 16 and B % 16 == 0) else 1
    bb = B // n_bc
    per_step = 2 * (bb * G * 2) + 2 * (bb * H * 4) + bb * H * 4
    tc = _pick_time_chunk(T, per_step)
    n_tc = T // tc
    unroll = 4 if tc % 4 == 0 else (2 if tc % 2 == 0 else 1)

    need_b = (2 * (tc * bb * G * 2) + 2 * (bb * tc * H * 4)
              + 2 * (H * G * 2 + 2 * G * 4) + 2 * (bb * H * 4)
              + bb * H * 4 + tc * bb * H * 4)

    kernel = functools.partial(ligru_rec_kernel, tc=tc, H=H, unroll=unroll)
    out, h_last = pl.pallas_call(
        kernel,
        out_shape=(jax.ShapeDtypeStruct((B, T, H), jnp.float32),
                   jax.ShapeDtypeStruct((B, H), jnp.float32)),
        grid=(n_bc, n_tc),
        in_specs=[pl.BlockSpec((tc, bb, G), lambda b, t: (t, b, 0)),
                  pl.BlockSpec((H, G), lambda b, t: (0, 0)),
                  pl.BlockSpec((1, G), lambda b, t: (0, 0)),
                  pl.BlockSpec((1, G), lambda b, t: (0, 0))],
        out_specs=(pl.BlockSpec((bb, tc, H), lambda b, t: (b, t, 0)),
                   pl.BlockSpec((bb, H), lambda b, t: (b, 0))),
        scratch_shapes=[pltpu.VMEM((bb, H), jnp.float32),
                        pltpu.VMEM((tc, bb, H), jnp.float32)],
        compiler_params=pltpu.CompilerParams(
            dimension_semantics=("parallel", "arbitrary"),
            vmem_limit_bytes=_vmem_limit(need_b, cap)),
    )(wx, u_bf, scale, shift)

    hh = h_last[None, :, :]               # (num_layers=1, B, H)
    return out, hh


# ----------------------------- pure-JAX reference -----------------------------
def ligru_reference(x, W, U, gamma, beta, H, eps=1e-5):
    B, T, F = x.shape
    wx = jnp.einsum("btf,gf->btg", x, W)                   # (B, T, 2H)
    flat = wx.reshape(B * T, 2 * H)
    mean = flat.mean(axis=0)
    var = ((flat - mean) ** 2).mean(axis=0)                # biased (BN train)
    wn = (wx - mean) / jnp.sqrt(var + eps) * gamma + beta
    ht = jnp.zeros((B, H), jnp.float32)
    outs = []
    for t in range(T):
        gates = wn[:, t] + ht @ U.T
        at = gates[:, :H]
        zt = jax.nn.sigmoid(gates[:, H:])
        hcand = jnp.maximum(at, 0.0)
        ht = zt * ht + (1.0 - zt) * hcand
        outs.append(ht)
    return jnp.stack(outs, axis=1), ht[None]


if __name__ == "__main__":
    B, T, F, H = 2, 8, 16, 32

    key = jax.random.PRNGKey(0)
    k_w, k_u, k_x = jax.random.split(key, 3)

    # nn.Linear(F, 2H) default init: U(-1/sqrt(F), 1/sqrt(F)), shape (2H, F)
    bound = 1.0 / math.sqrt(F)
    W = jax.random.uniform(k_w, (2 * H, F), jnp.float32, -bound, bound)
    # recurrent weight (2H, H): orthogonal init (orthonormal columns)
    U = jnp.linalg.qr(jax.random.normal(k_u, (2 * H, H), dtype=jnp.float32))[0]
    gamma = jnp.ones((2 * H,), jnp.float32)
    beta = jnp.zeros((2 * H,), jnp.float32)

    # kernel-friendly fused parameter layout
    params = dict(
        w=W.T,                                # (F, 2H)
        u=U.T,                                # (H, 2H)
        gamma=gamma.reshape(1, 2 * H),
        beta=beta.reshape(1, 2 * H),
    )

    x = jax.random.normal(k_x, (B, T, F), jnp.float32)

    out, hh = ligru_forward(x, params)
    jax.block_until_ready((out, hh))

    ref_out, ref_hh = ligru_reference(x, W, U, gamma, beta, H)
    assert out.shape == (B, T, H) and hh.shape == (1, B, H)
    # bf16 MXU operands + bf16 wx storage -> ~1e-2-level agreement vs the
    # pure-f32 reference; BN stats themselves are accumulated in f32.
    assert jnp.allclose(out, ref_out, atol=2e-2, rtol=2e-2), "output mismatch"
    assert jnp.allclose(hh, ref_hh, atol=2e-2, rtol=2e-2), "hidden mismatch"

    print("KERNEL_OK")
</pallas_src>

<mosaic_0001>
module attributes {stable_mosaic.version = 11 : i64} {
  func.func @ligru_proj_kernel(%arg0: i32, %arg1: memref<16x16xbf16, #tpu.memory_space<vmem>>, %arg2: memref<16x64xbf16, #tpu.memory_space<vmem>>, %arg3: memref<16x64xbf16, #tpu.memory_space<vmem>>, %arg4: memref<1x8x64xf32, #tpu.memory_space<vmem>>) attributes {dimension_semantics = [#tpu.dimension_semantics<parallel>], iteration_bounds = array<i64: 1>, scalar_prefetch = 0 : i64, scratch_operands = 0 : i64, tpu.core_type = #tpu.core_type<tc>, window_params = [{transform_indices = @transform_0, window_bounds = array<i64: 16, 16>}, {pipeline_mode = #tpu.pipeline_mode<synchronous>, transform_indices = @transform_1, window_bounds = array<i64: 16, 64>}, {transform_indices = @transform_2, window_bounds = array<i64: 16, 64>}, {transform_indices = @transform_3, window_bounds = array<i64: 1, 8, 64>}]} {
    %c0 = arith.constant 0 : index
    %c0_0 = arith.constant 0 : index
    %0 = vector.load %arg1[%c0, %c0_0] : memref<16x16xbf16, #tpu.memory_space<vmem>>, vector<16x16xbf16>
    %c0_1 = arith.constant 0 : index
    %c0_2 = arith.constant 0 : index
    %1 = vector.load %arg2[%c0_1, %c0_2] : memref<16x64xbf16, #tpu.memory_space<vmem>>, vector<16x64xbf16>
    %cst = arith.constant dense<0.000000e+00> : vector<16x64xf32>
    %2 = tpu.matmul %0, %1, %cst {dimension_numbers = #tpu.dot_dimension_numbers<[1], [0], [0], [1], [0, 0, 1, 1], [], []>} : vector<16x16xbf16>, vector<16x64xbf16>, vector<16x64xf32> -> vector<16x64xf32>
    %3 = arith.truncf %2 : vector<16x64xf32> to vector<16x64xbf16>
    %c0_3 = arith.constant 0 : index
    %c0_4 = arith.constant 0 : index
    %4 = vector.load %arg3[%c0_3, %c0_4] : memref<16x64xbf16, #tpu.memory_space<vmem>>, vector<16x64xbf16>
    tpu.vector_store %arg3[%c0_3, %c0_4], %3 {strides = array<i32>} : memref<16x64xbf16, #tpu.memory_space<vmem>>, vector<16x64xbf16>,
    %cst_5 = arith.constant dense<0.000000e+00> : vector<64xf32>
    %5 = vector.multi_reduction <add>, %2, %cst_5 [0] : vector<16x64xf32> to vector<64xf32>
    %6 = vector.shape_cast %5 : vector<64xf32> to vector<1x64xf32>
    %7 = arith.mulf %2, %2 : vector<16x64xf32>
    %cst_6 = arith.constant dense<0.000000e+00> : vector<64xf32>
    %8 = vector.multi_reduction <add>, %7, %cst_6 [0] : vector<16x64xf32> to vector<64xf32>
    %9 = vector.shape_cast %8 : vector<64xf32> to vector<1x64xf32>
    %cst_7 = arith.constant 0.000000e+00 : f32
    %10 = vector.broadcast %cst_7 : f32 to vector<6x64xf32>
    %11 = tpu.concatenate %6, %9, %10 in 0 : vector<1x64xf32>, vector<1x64xf32>, vector<6x64xf32> -> vector<8x64xf32>
    %12 = vector.shape_cast %11 : vector<8x64xf32> to vector<1x8x64xf32>
    %c0_8 = arith.constant 0 : index
    %c0_9 = arith.constant 0 : index
    %c0_10 = arith.constant 0 : index
    %13 = vector.load %arg4[%c0_8, %c0_9, %c0_10] : memref<1x8x64xf32, #tpu.memory_space<vmem>>, vector<1x8x64xf32>
    tpu.vector_store %arg4[%c0_8, %c0_9, %c0_10], %12 {strides = array<i32>} : memref<1x8x64xf32, #tpu.memory_space<vmem>>, vector<1x8x64xf32>,
    return
  }
  func.func @transform_0(%arg0: i32) -> (i32, i32) {
    %c0_i32 = arith.constant 0 : i32
    %c0_i32_0 = arith.constant 0 : i32
    return %arg0, %c0_i32 : i32, i32
  }
  func.func @transform_1(%arg0: i32) -> (i32, i32) {
    %c0_i32 = arith.constant 0 : i32
    %c0_i32_0 = arith.constant 0 : i32
    %c0_i32_1 = arith.constant 0 : i32
    return %c0_i32, %c0_i32_0 : i32, i32
  }
  func.func @transform_2(%arg0: i32) -> (i32, i32) {
    %c0_i32 = arith.constant 0 : i32
    %c0_i32_0 = arith.constant 0 : i32
    return %arg0, %c0_i32 : i32, i32
  }
  func.func @transform_3(%arg0: i32) -> (i32, i32, i32) {
    %c0_i32 = arith.constant 0 : i32
    %c0_i32_0 = arith.constant 0 : i32
    %c0_i32_1 = arith.constant 0 : i32
    return %arg0, %c0_i32, %c0_i32_0 : i32, i32, i32
  }
}

</mosaic_0001>

<bundles_post_ra>
// kernel: tpu_custom_call.1
= control target key start
LH: loop header
LB: loop body
LE: loop exit
PB: predicated region body
PF: predicated region fallthrough
CT: control target
= control target key end

     0   :  { %9 = vsyncpa [#allocation3], 0  ;;  %s342_s0 = inlined_call_operand.hbm [shape: bf16[16,16], index: 0, kind: input, shape index: {}]   ;;  %s343_s1 = inlined_call_operand.hbm [shape: bf16[16,64], index: 1, kind: input, shape index: {}]   ;;  %s344_s2 = inlined_call_operand.hbm [shape: bf16[16,64], index: 2, kind: output, shape index: {0}]   ;;  %s345_s3 = inlined_call_operand.hbm [shape: f32[1,8,64], index: 3, kind: output, shape index: {1}]  }
   0x1   :  { %10 = vsyncpa [#allocation6], 0 }
   0x2   :  { %11 = vsyncpa [#allocation4], 0 }
   0x3   :  { %12 = vsyncpa [#allocation9], 0  ;;  %s286_s12 = smov [#allocation2]  }
   0x4   :  { %s18_s13 = sshll.u32 %s286_s12, 4  ;;  %s19_s13 = int_to_ptr.vmem [resolvable:$true] %s18_s13 }
   0x5   :  { %s206_s14 = scalar_lea.vmem %s19_s13, 128  ;;  %p211_p1 = scmp.lt.s32.totalorder %s19_s13, %s19_s13 }
   0x6   :  { %p207_p0 = scmp.ne.s32.totalorder %s19_s13, %s206_s14  ;;  %p212_p2 = scmp.lt.s32.totalorder %s206_s14, %s206_s14 }
   0x8   :  { %p213_p3 = por %p212_p2, %p211_p1 }
   0xa   :  { %p214_p4 = pnand %p213_p3, %p207_p0 }
   0xc   :  { %217 = shalt.err (!%p214_p4)
}
   0xd   :  { %s287_s15 = smov 64   ;;  %s288_s16 = smov 4  }
   0xe   :  { %24 = dma.hbm_to_vmem [thread:$0]  %s342_s0, 128, %s19_s13, [#allocation3], %s287_s15, %s287_s15, %s288_s16  }
   0xf   :  { %s289_s19 = smov [#allocation5]  }
  0x10   :  { %s30_s20 = sshll.u32 %s289_s19, 4  ;;  %s31_s20 = int_to_ptr.vmem [resolvable:$true] %s30_s20 }
  0x11   :  { %s226_s21 = scalar_lea.vmem %s31_s20, 128  ;;  %p231_p6 = scmp.lt.s32.totalorder %s31_s20, %s31_s20 }
  0x12   :  { %p227_p5 = scmp.ne.s32.totalorder %s31_s20, %s226_s21  ;;  %p232_p7 = scmp.lt.s32.totalorder %s226_s21, %s226_s21 }
  0x14   :  { %p233_p8 = por %p232_p7, %p231_p6 }
  0x16   :  { %p234_p9 = pnand %p233_p8, %p227_p5 }
  0x18   :  { %237 = shalt.err (!%p234_p9)
}
  0x19   :  { %36 = dma.hbm_to_vmem [thread:$0]  %s343_s1, 128, %s31_s20, [#allocation6], %s287_s15, %s287_s15, %s288_s16  }
  0x1a   :  { %278 = dma.done.wait [#allocation3], 128  }
  0x1b   :  { %279 = vsyncadd [#allocation3], 4294967168 }
  0x1c   :  { %280 = dma.done.wait [#allocation6], 128  }
  0x1d   :  { %281 = vsyncadd [#allocation6], 4294967168  ;;  %v290_v0 = vmov 0.0   ;;  %vm291_vm0 = vmmov 0   ;;  %v196_v1 = vld [vmem:[#allocation5] sm:$0xff]   ;;  %v197_v2 = vld [vmem:[#allocation2] sm:$0xff]  }
  0x1e   :  { %182 = vmatprep.subr.bf16.mxu0 %v290_v0  ;;  %184 = vmatprep.mubr.msk.bf16.mxu0 %vm291_vm0, %v290_v0  ;;  %vm59_vm1 = vcmask 130048   ;;  %vm112_vm2 = vcmask 519168   ;;  %vm115_vm3 = vcmask 523264   ;;  %s292_s0 = smov [#allocation7]  }
  0x1f   :  { %183 = vmatpush3.bf16.msra.mxu0 %v196_v1  ;;  %s146_s1 = sshll.u32 %s292_s0, 4  ;;  %s147_s1 = int_to_ptr.vmem [resolvable:$true] %s146_s1 }
  0x20   :  { %s238_s24 = scalar_lea.vmem %s147_s1, 128  ;;  %p243_p11 = scmp.lt.s32.totalorder %s147_s1, %s147_s1 }
  0x21   :  { %p239_p10 = scmp.ne.s32.totalorder %s147_s1, %s238_s24  ;;  %p244_p12 = scmp.lt.s32.totalorder %s238_s24, %s238_s24 }
  0x22   :  { %185 = vmatmul.mubr.msk.bf16.vlgmr.msra.gmra.mxu0 %vm59_vm1, %v197_v2 }
  0x23   :  { %p245_p13 = por %p244_p12, %p243_p11 }
  0x25   :  { %p246_p0 = pnand %p245_p13, %p239_p10 }
  0xe2   :  { %v97_v3 = vpop.f32.mrf.mxu0 }
  0xe3   :  { %v178_v4 = vpack.c.bf16 %v97_v3, %v97_v3  ;;  %v125_v6 = vmul.f32 %v97_v3, %v97_v3  ;;  %v116_v8 = vsel %vm115_vm3, %v97_v3, 0.0 }
  0xe4   :  { %v186_v5 = vpop.f32.mrf.mxu0 }
  0xe5   :  { %113 = vst.msk [vmem:[#allocation7] sm:$0xf] %vm112_vm2, %v178_v4  ;;  %v127_v14 = vsel %vm115_vm3, %v125_v6, 0.0 }
  0xe6   :  { %v100_v7 = vpop.f32.mrf.mxu0 }
  0xe7   :  { %v179_v9 = vpack.c.bf16 %v100_v7, %v100_v7  ;;  %v117_v10 = vsel %vm115_vm3, %v100_v7, 0.0  ;;  %v126_v11 = vmul.f32 %v100_v7, %v100_v7 }
  0xe8   :  { %v118_v12 = vadd.f32 %v117_v10, %v116_v8  ;;  %v187_v13 = vpop.f32.mrf.mxu0 }
  0xe9   :  { %v128_v15 = vsel %vm115_vm3, %v126_v11, 0.0  ;;  %114 = vst.msk [vmem:[#allocation7 + $0x4] sm:$0xf] %vm112_vm2, %v179_v9 }
  0xea   :  { %v119_v16 = vrot.slane %v118_v12, 4  ;;  %v129_v17 = vadd.f32 %v128_v15, %v127_v14 }
  0xeb   :  { %249 = shalt.err (!%p246_p0)
}
  0xec   :  { %152 = dma.vmem_to_hbm [thread:$0]  %s147_s1, 128, %s344_s2, [#allocation4], %s287_s15, %s287_s15, %s288_s16   ;;  %v120_v18 = vadd.f32 %v119_v16, %v118_v12  ;;  %v130_v19 = vrot.slane %v129_v17, 4  ;;  %vm136_vm4 = vcmask 1040384   ;;  %vm138_vm5 = vcmask 1041408  }
  0xed   :  { %s293_s27 = smov [#allocation8]  }
  0xee   :  { %v121_v20 = vrot.slane %v120_v18, 2  ;;  %v131_v21 = vadd.f32 %v130_v19, %v129_v17  ;;  %s159_s28 = sshll.u32 %s293_s27, 4  ;;  %s160_s28 = int_to_ptr.vmem [resolvable:$true] %s159_s28 }
  0xef   :  { %s258_s2 = scalar_lea.vmem %s160_s28, 128  ;;  %p263_p2 = scmp.lt.s32.totalorder %s160_s28, %s160_s28 }
  0xf0   :  { %v122_v22 = vadd.f32 %v121_v20, %v120_v18  ;;  %v132_v23 = vrot.slane %v131_v21, 2  ;;  %p259_p1 = scmp.ne.s32.totalorder %s160_s28, %s258_s2  ;;  %p264_p3 = scmp.lt.s32.totalorder %s258_s2, %s258_s2 }
  0xf2   :  { %v123_v24 = vrot.slane %v122_v22, 1  ;;  %v133_v25 = vadd.f32 %v132_v23, %v131_v21  ;;  %p265_p4 = por %p264_p3, %p263_p2 }
  0xf4   :  { %v134_v26 = vrot.slane %v133_v25, 1  ;;  %v124_v27 = vadd.f32 %v123_v24, %v122_v22  ;;  %p266_p5 = pnand %p265_p4, %p259_p1 }
  0xf6   :  { %v135_v28 = vadd.f32 %v134_v26, %v133_v25 }
  0xf8   :  { %v137_v29 = vsel %vm136_vm4, %v124_v27, %v135_v28 }
  0xf9   :  { %v139_v30 = vsel %vm138_vm5, %v137_v29, 0.0 }
  0xfa   :  { %140 = vst.msk [vmem:[#allocation8] sm:$0xff] %vm115_vm3, %v139_v30 }
  0xfb   :  { %269 = shalt.err (!%p266_p5)
}
  0xfc   :  { %162 = dma.vmem_to_hbm [thread:$0]  %s160_s28, 128, %s345_s3, [#allocation9]  }
  0xfd   :  { %282 = dma.done.wait [#allocation4], 128  }
  0xfe   :  { %283 = vsyncadd [#allocation4], 4294967168 }
  0xff   :  { %284 = dma.done.wait [#allocation9], 128  }
 0x100   :  { %285 = vsyncadd [#allocation9], 4294967168 }
 0x101   :  { %169 = vsyncpa [#allocation3], 1 }
 0x102   :  { %170 = vsyncpa [#allocation6], 1 }
 0x103   :  { %171 = vsyncpa [#allocation4], 1 }
 0x104   :  { %172 = vsyncpa [#allocation9], 1 }

</bundles_post_ra>
